<compile_context>
chip_gen: v7x
topology: tpu7x:2x2x1
jax: 0.10.0
libtpu: 0.0.40
codegen_flags: <defaults>
</compile_context>

<pallas_src>
import jax
import jax.numpy as jnp
from jax import lax
from jax.experimental import pallas as pl
from jax.experimental.pallas import tpu as pltpu


# -----------------------------------------------------------------------------
# Pallas kernel: o[C, TM] = W^T[C, H] @ x[TM, H]^T + b[C, 1]
# -----------------------------------------------------------------------------
def _linear_kernel(x_ref, wt_ref, b_ref, o_ref):
    # x_ref: [TM, H], wt_ref: [C, H], b_ref: [C, 1], o_ref: [C, TM]
    acc = lax.dot_general(
        wt_ref[...],
        x_ref[...],
        dimension_numbers=(((1,), (1,)), ((), ())),  # contract H with H -> [C, TM]
        preferred_element_type=jnp.float32,
    )
    o_ref[...] = (acc + b_ref[...]).astype(o_ref.dtype)


def linear_pallas(x2d, weight, bias, *, tm=8192):
    """x2d: [M, H] f32; weight: [H, C]; bias: [C] -> [M, C]."""
    M, H = x2d.shape
    H2, C = weight.shape
    assert H == H2
    wt = weight.T                # [C, H]  (tiny, one-off)
    b2d = bias.reshape(C, 1)     # [C, 1]

    # Row-tile size: large enough to amortize the ~0.35us per-grid-step cost,
    # small enough that the lane-padded [TM, 32] f32 tile (4 MiB/buffer at
    # TM=8192) stays well inside every generation's scoped-VMEM budget.
    TM = M if M <= tm else tm
    grid = (pl.cdiv(M, TM),)

    out_t = pl.pallas_call(
        _linear_kernel,
        out_shape=jax.ShapeDtypeStruct((C, M), x2d.dtype),
        grid=grid,
        in_specs=[
            pl.BlockSpec((TM, H), lambda i: (i, 0)),   # x row tile, pipelined
            pl.BlockSpec((C, H), lambda i: (0, 0)),    # W^T, VMEM-resident
            pl.BlockSpec((C, 1), lambda i: (0, 0)),    # bias, VMEM-resident
        ],
        out_specs=pl.BlockSpec((C, TM), lambda i: (0, i)),  # lane-dense output
        compiler_params=pltpu.CompilerParams(
            dimension_semantics=("parallel",),          # megacore sharding on v7x
            vmem_limit_bytes=32 * 1024 * 1024,
        ),
        cost_estimate=pl.CostEstimate(
            flops=2 * M * H * C,
            transcendentals=0,
            bytes_accessed=4 * (M * H + H * C + M * C),
        ),
    )(x2d, wt, b2d)
    return out_t.T               # [M, C]; tiny transpose of the small output


# -----------------------------------------------------------------------------
# Module-equivalent wrapper
# -----------------------------------------------------------------------------
class ThinkingOfLatents:
    def __init__(self, hidden_dim=32, n_classes=4, key=None):
        self.hidden_dim = hidden_dim
        self.n_classes = n_classes
        if key is None:
            key = jax.random.PRNGKey(42)
        # torch.randn(hidden_dim, n_classes) equivalent (deterministic init)
        self.weight = jax.random.normal(
            key, (hidden_dim, n_classes), dtype=jnp.float32
        )
        self.bias = jnp.zeros((n_classes,), dtype=jnp.float32)

    def _perturbed_weights(self, noise_key):
        """Training-mode conjugate-noise weight perturbation (plain-JAX glue)."""
        w_t = self.weight.T  # [C, H]
        normalized = w_t / jnp.clip(
            jnp.linalg.norm(w_t, axis=1, keepdims=True), 1e-12
        )  # [C, H]
        noise = jax.random.normal(noise_key, (1, self.hidden_dim), jnp.float32)
        projections = noise @ normalized.T           # [1, C]
        weight_space = projections @ normalized      # [1, H]
        conj = noise - weight_space
        conj = conj / jnp.clip(jnp.linalg.norm(conj, axis=1, keepdims=True), 1e-12)
        noise_scale = jnp.mean(jnp.linalg.norm(self.weight, axis=0))
        return self.weight + conj.T * noise_scale    # [H, C]

    def __call__(self, x, training=False, noise_key=None):
        if training:
            if noise_key is None:
                noise_key = jax.random.PRNGKey(7)
            weights = self._perturbed_weights(noise_key)
        else:
            weights = self.weight

        lead_shape = x.shape[:-1]
        x2d = x.reshape(-1, self.hidden_dim)
        out2d = linear_pallas(x2d, weights, self.bias)
        out = out2d.reshape(*lead_shape, self.n_classes)
        # Mirrors torch's `output.squeeze()` (drops ALL size-1 dims).
        return jnp.squeeze(out)


# -----------------------------------------------------------------------------
# Demo / self-check
# -----------------------------------------------------------------------------
if __name__ == "__main__":
    hidden_dim, n_classes = 32, 4
    batch, seq = 2, 8

    key = jax.random.PRNGKey(0)
    kx, kw, kx2 = jax.random.split(key, 3)

    module = ThinkingOfLatents(hidden_dim=hidden_dim, n_classes=n_classes, key=kw)
    x = jax.random.normal(kx, (batch, seq, hidden_dim), dtype=jnp.float32)

    # 1) Eval-mode forward (hot path = Pallas kernel), single tile.
    out = jax.block_until_ready(module(x, training=False))
    ref = x.reshape(-1, hidden_dim) @ module.weight + module.bias
    ref = jnp.squeeze(ref.reshape(batch, seq, n_classes))
    assert out.shape == (batch, seq, n_classes), out.shape
    assert jnp.allclose(out, ref, atol=1e-5, rtol=1e-5)

    # 2) Tiled path (grid > 1, full blocks): M = 1280 rows, tm = 128.
    x_big = jax.random.normal(kx2, (1280, hidden_dim), dtype=jnp.float32)
    out_big = jax.block_until_ready(
        linear_pallas(x_big, module.weight, module.bias, tm=128)
    )
    ref_big = x_big @ module.weight + module.bias
    assert jnp.allclose(out_big, ref_big, atol=1e-5, rtol=1e-5)

    # 3) Tiled path with a partial last block: M = 300 rows, tm = 128.
    x_odd = x_big[:300]
    out_odd = jax.block_until_ready(
        linear_pallas(x_odd, module.weight, module.bias, tm=128)
    )
    ref_odd = x_odd @ module.weight + module.bias
    assert jnp.allclose(out_odd, ref_odd, atol=1e-5, rtol=1e-5)

    # 4) Training-mode forward also exercises the kernel (noise path is glue).
    out_train = jax.block_until_ready(module(x, training=True))
    assert out_train.shape == (batch, seq, n_classes)

    print("KERNEL_OK")
</pallas_src>

<mosaic_0001>
module attributes {stable_mosaic.version = 11 : i64} {
  func.func @_linear_kernel(%arg0: i32, %arg1: memref<16x32xf32, #tpu.memory_space<vmem>>, %arg2: memref<4x32xf32, #tpu.memory_space<vmem>>, %arg3: memref<4x1xf32, #tpu.memory_space<vmem>>, %arg4: memref<4x16xf32, #tpu.memory_space<vmem>>) attributes {dimension_semantics = [#tpu.dimension_semantics<parallel>], iteration_bounds = array<i64: 1>, scalar_prefetch = 0 : i64, scratch_operands = 0 : i64, tpu.core_type = #tpu.core_type<tc>, window_params = [{transform_indices = @transform_0, window_bounds = array<i64: 16, 32>}, {pipeline_mode = #tpu.pipeline_mode<synchronous>, transform_indices = @transform_1, window_bounds = array<i64: 4, 32>}, {pipeline_mode = #tpu.pipeline_mode<synchronous>, transform_indices = @transform_2, window_bounds = array<i64: 4, 1>}, {transform_indices = @transform_3, window_bounds = array<i64: 4, 16>}]} {
    %c0 = arith.constant 0 : index
    %c0_0 = arith.constant 0 : index
    %0 = vector.load %arg2[%c0, %c0_0] : memref<4x32xf32, #tpu.memory_space<vmem>>, vector<4x32xf32>
    %c0_1 = arith.constant 0 : index
    %c0_2 = arith.constant 0 : index
    %1 = vector.load %arg1[%c0_1, %c0_2] : memref<16x32xf32, #tpu.memory_space<vmem>>, vector<16x32xf32>
    %cst = arith.constant dense<0.000000e+00> : vector<4x16xf32>
    %2 = tpu.matmul %0, %1, %cst {dimension_numbers = #tpu.dot_dimension_numbers<[1], [1], [0], [0], [0, 0, 1, 0], [], []>} : vector<4x32xf32>, vector<16x32xf32>, vector<4x16xf32> -> vector<4x16xf32>
    %c0_3 = arith.constant 0 : index
    %c0_4 = arith.constant 0 : index
    %3 = vector.load %arg3[%c0_3, %c0_4] : memref<4x1xf32, #tpu.memory_space<vmem>>, vector<4x1xf32>
    %4 = vector.broadcast %3 : vector<4x1xf32> to vector<4x16xf32>
    %5 = arith.addf %2, %4 : vector<4x16xf32>
    %c0_5 = arith.constant 0 : index
    %c0_6 = arith.constant 0 : index
    %6 = vector.load %arg4[%c0_5, %c0_6] : memref<4x16xf32, #tpu.memory_space<vmem>>, vector<4x16xf32>
    tpu.vector_store %arg4[%c0_5, %c0_6], %5 {strides = array<i32>} : memref<4x16xf32, #tpu.memory_space<vmem>>, vector<4x16xf32>,
    return
  }
  func.func @transform_0(%arg0: i32) -> (i32, i32) {
    %c0_i32 = arith.constant 0 : i32
    %c0_i32_0 = arith.constant 0 : i32
    return %arg0, %c0_i32 : i32, i32
  }
  func.func @transform_1(%arg0: i32) -> (i32, i32) {
    %c0_i32 = arith.constant 0 : i32
    %c0_i32_0 = arith.constant 0 : i32
    %c0_i32_1 = arith.constant 0 : i32
    return %c0_i32, %c0_i32_0 : i32, i32
  }
  func.func @transform_2(%arg0: i32) -> (i32, i32) {
    %c0_i32 = arith.constant 0 : i32
    %c0_i32_0 = arith.constant 0 : i32
    %c0_i32_1 = arith.constant 0 : i32
    return %c0_i32, %c0_i32_0 : i32, i32
  }
  func.func @transform_3(%arg0: i32) -> (i32, i32) {
    %c0_i32 = arith.constant 0 : i32
    %c0_i32_0 = arith.constant 0 : i32
    return %c0_i32, %arg0 : i32, i32
  }
}

</mosaic_0001>

<bundles_post_ra>
// kernel: tpu_custom_call.1
= control target key start
LH: loop header
LB: loop body
LE: loop exit
PB: predicated region body
PF: predicated region fallthrough
CT: control target
= control target key end

     0   :  { %8 = vsyncpa [#allocation3], 0  ;;  %s267_s0 = inlined_call_operand.hbm [shape: f32[16,32], index: 0, kind: input, shape index: {}]   ;;  %s268_s1 = inlined_call_operand.vmem [shape: f32[4,32], index: 1, kind: input, shape index: {}]   ;;  %s269_s2 = inlined_call_operand.vmem [shape: f32[4,1], index: 2, kind: input, shape index: {}]   ;;  %s270_s3 = inlined_call_operand.hbm [shape: f32[4,16], index: 3, kind: output, shape index: {}]  }
   0x1   :  { %9 = vsyncpa [#allocation4], 0  ;;  %s209_s12 = smov [#allocation2]   ;;  %s161_s16 = scalar_lea.hbm %s267_s0, 256 }
   0x2   :  { %s15_s13 = sshll.u32 %s209_s12, 4  ;;  %p162_p0 = scmp.ne.s32.totalorder %s267_s0, %s161_s16  ;;  %s16_s13 = int_to_ptr.vmem [resolvable:$true] %s15_s13 }
   0x3   :  { %p165_p1 = scmp.lt.u32.totalorder %s161_s16, %s267_s0 }
   0x5   :  { %p167_p2 = pnand %p165_p1, %p162_p0 }
   0x7   :  { %170 = shalt.err (!%p167_p2)
}
   0x8   :  { %s171_s21 = scalar_lea.vmem %s16_s13, 256  ;;  %p176_p4 = scmp.lt.s32.totalorder %s16_s13, %s16_s13 }
   0x9   :  { %p172_p3 = scmp.ne.s32.totalorder %s16_s13, %s171_s21  ;;  %p177_p5 = scmp.lt.s32.totalorder %s171_s21, %s171_s21 }
   0xb   :  { %p178_p6 = por %p177_p5, %p176_p4 }
   0xd   :  { %p179_p7 = pnand %p178_p6, %p172_p3 }
   0xf   :  { %182 = shalt.err (!%p179_p7)
}
  0x10   :  { %s210_s22 = smov 128   ;;  %s211_s23 = smov 8  }
  0x11   :  { %21 = dma.hbm_to_vmem [thread:$0]  %s267_s0, 256, %s16_s13, [#allocation3], %s210_s22, %s210_s22, %s211_s23  }
  0x12   :  { %205 = dma.done.wait [#allocation3], 256  }
  0x13   :  { %206 = vsyncadd [#allocation3], 4294967040  ;;  %v212_v0 = vmov 0.0|0.0   ;;  %vm213_vm0 = vmmov 0   ;;  %v214_v1 = vmov 0.0   ;;  %v215_v2 = vmov 0  }
  0x14   :  { %148 = vmatprep.subr.bf16.mxu0 %v212_v0  ;;  %145 = vmatprep.mubr.msk.f32.mxu0 %vm213_vm0, %v214_v1  ;;  %vm38_vm1 = vcmask 261120   ;;  %v30_v3 = vld [vmem:[#allocation2] sm:$0xff]  ;;  %v31_v4 = vld [vmem:[#allocation2 + $0x8] sm:$0xff]  ;;  %s216_s29 = smov [#allocation5]   ;;  %vm118_vm3 = vcmask 125952  }
  0x15   :  { %160 = vset.pattern.permute.xlu0 %v215_v2  ;;  %vm150_vm2 = vmpackc.low %vm38_vm1, %vm38_vm1  ;;  %v149_v5 = vpack.c.bf16 %v31_v4, %v30_v3  ;;  %v32_v6 = vld [vmem:[%s269_s2] sm:$0xf]  ;;  %s126_s30 = sshll.u32 %s216_s29, 4  ;;  %s127_s30 = int_to_ptr.vmem [resolvable:$true] %s126_s30 }
  0x16   :  { %35 = vperm.xlu0 %160, %v32_v6   ;;  %v29_v7 = vld [vmem:[%s268_s1] sm:$0xf]  ;;  %s183_s4 = scalar_lea.vmem %s127_s30, 64  ;;  %p188_p9 = scmp.lt.s32.totalorder %s127_s30, %s127_s30 }
  0x17   :  { %151 = vmatpush3.bf16.xpose.msk.msra.mxu0 %vm150_vm2, %v149_v5  ;;  %p184_p8 = scmp.ne.s32.totalorder %s127_s30, %s183_s4  ;;  %p189_p10 = scmp.lt.s32.totalorder %s183_s4, %s183_s4 }
  0x19   :  { %p190_p11 = por %p189_p10, %p188_p9 }
  0x1b   :  { %p191_p12 = pnand %p190_p11, %p184_p8 }
  0x1e   :  { %146 = vmatmul.mubr.msk.f32.vlgmr.msra.gmra.mrb[0].mxu0 %vm38_vm1, %v29_v7 }
  0x95   :  { %v36_v8 = vpop.permute.xlu0 %35 }
  0xf1   :  { %v114_v9 = vpop.f32.mrb[0].mxu0 }
  0xf2   :  { %v115_v10 = vadd.f32 %v114_v9, %v36_v8  ;;  %v147_v11 = vpop.f32.mrb[1].mxu0 }
  0xf4   :  { %119 = vst.msk [vmem:[#allocation5] sm:$0xf] %vm118_vm3, %v115_v10 }
  0xf5   :  { %194 = shalt.err (!%p191_p12)
}
  0xf6   :  { %s195_s1 = scalar_lea.hbm %s270_s3, 64 }
  0xf7   :  { %p196_p13 = scmp.ne.s32.totalorder %s270_s3, %s195_s1  ;;  %p199_p0 = scmp.lt.u32.totalorder %s195_s1, %s270_s3 }
  0xf9   :  { %p201_p1 = pnand %p199_p0, %p196_p13 }
  0xfb   :  { %204 = shalt.err (!%p201_p1)
}
  0xfc   :  { %129 = dma.vmem_to_hbm [thread:$0]  %s127_s30, 64, %s270_s3, [#allocation4]  }
  0xfd   :  { %207 = dma.done.wait [#allocation4], 64  }
  0xfe   :  { %208 = vsyncadd [#allocation4], 4294967232 }
  0xff   :  { %133 = vsyncpa [#allocation3], 1 }
 0x100   :  { %134 = vsyncpa [#allocation4], 1 }

</bundles_post_ra>
